<compile_context>
chip_gen: v5e
topology: v5e:2x2
jax: 0.10.0
libtpu: 0.0.40
codegen_flags: <defaults>
</compile_context>

<pallas_src>
import functools

import jax
import jax.numpy as jnp
from jax import lax
from jax.experimental import pallas as pl
from jax.experimental.pallas import tpu as pltpu


_LANE = 128
_SUBLANE = 8
_STEP_BYTES = 8 * 1024 * 1024       # target HBM bytes (both inputs) per grid step
_VMEM_LIMIT = 48 * 1024 * 1024      # safe on v7x (64 MiB phys); ample on v5e/v6e


def _dice_sums_kernel(x_ref, y_ref, i_ref, u_ref, *,
                      b_n, r_block, sub_r, rows_total, num_k):
    """Accumulate lane/sublane-wise (b_n, 8, 128) partials of
    sum(sigmoid(x)*y) and sum(sigmoid(x)+y), streaming r_block rows per tile."""
    k = pl.program_id(1)            # D-tile (reduction) axis

    @pl.when(k == 0)
    def _():
        i_ref[...] = jnp.zeros_like(i_ref)
        u_ref[...] = jnp.zeros_like(u_ref)

    def process_groups(r0, ngroups, carry):
        # Statically-unrolled pass over `ngroups` (b_n, 8, 128) row groups.
        acc_i, acc_u = carry
        for j in range(ngroups):
            off = r0 + j * _SUBLANE
            if not isinstance(off, int):
                off = pl.multiple_of(off, _SUBLANE)
            xs = x_ref[:, pl.ds(off, _SUBLANE), :].astype(jnp.float32)
            ys = y_ref[:, pl.ds(off, _SUBLANE), :].astype(jnp.float32)
            # sigmoid(x) == 0.5*(tanh(0.5*x)+1): a single EUP op per vreg.
            s = 0.5 * (jnp.tanh(0.5 * xs) + 1.0)
            acc_i = acc_i + s * ys
            acc_u = acc_u + (s + ys)
        return acc_i, acc_u

    def accum(valid_rows):
        # valid_rows is static and a multiple of 8 (wrapper pads D to 8*128),
        # so no per-element masking is ever needed.
        carry = (jnp.zeros((b_n, _SUBLANE, _LANE), jnp.float32),
                 jnp.zeros((b_n, _SUBLANE, _LANE), jnp.float32))
        n_main = valid_rows // sub_r
        if n_main > 0:
            def body(r, c):
                return process_groups(r * sub_r, sub_r // _SUBLANE, c)
            carry = lax.fori_loop(0, n_main, body, carry)
        rem = valid_rows - n_main * sub_r          # static, multiple of 8
        if rem > 0:
            carry = process_groups(n_main * sub_r, rem // _SUBLANE, carry)
        acc_i, acc_u = carry
        i_ref[...] += acc_i
        u_ref[...] += acc_u

    tail_rows = rows_total - (num_k - 1) * r_block
    if tail_rows == r_block:
        accum(r_block)                              # no ragged D tile at all
    else:
        last = num_k - 1

        @pl.when(k != last)
        def _():
            accum(r_block)

        @pl.when(k == last)                         # shorter static row loop
        def _():
            accum(tail_rows)


def _per_sample_sums(x2d, y2d):
    """x2d, y2d: (N, D) in native dtype. Returns per-sample (i, u) sums, (N,)."""
    n, d = x2d.shape

    # Pad the flattened feature axis to a multiple of 8*128 so the (rows, 128)
    # view is sublane-aligned and every valid row count is a multiple of 8.
    # Pad values are sigmoid-neutral: sigmoid(-1e9) == 0 (also -inf for fp16)
    # and y-pad == 0, so padded elements contribute nothing to either sum.
    # TODO(synk): when D % 1024 != 0 this jnp.pad materializes one extra HBM
    # copy of both inputs; an in-kernel flat-index tail mask would avoid it.
    d_tile = _SUBLANE * _LANE
    d_pad = pl.cdiv(d, d_tile) * d_tile
    if d_pad != d:
        x2d = jnp.pad(x2d, ((0, 0), (0, d_pad - d)), constant_values=-1e9)
        y2d = jnp.pad(y2d, ((0, 0), (0, d_pad - d)), constant_values=0)
    rows = d_pad // _LANE                           # multiple of 8

    # Byte-budget block sizing: ~8 MiB of input (both operands) per grid step;
    # 2 inputs x 2 pipeline buffers => ~16 MiB VMEM, well under _VMEM_LIMIT.
    itemsize = x2d.dtype.itemsize + y2d.dtype.itemsize
    budget_rows = max(_SUBLANE, _STEP_BYTES // (_LANE * itemsize))

    if rows >= budget_rows:
        # Large D: one sample per step, big row tiles.
        b_n = 1
        sub_r = 64
        r_block = max(sub_r, (budget_rows // sub_r) * sub_r)
    else:
        # Small D: pack several samples per step (capped for vreg pressure).
        r_block = rows
        b_n = int(max(1, min(n, budget_rows // rows, 8)))
        sub_r = max(_SUBLANE, ((64 // b_n) // _SUBLANE) * _SUBLANE)

    num_k = pl.cdiv(rows, r_block)
    num_i = pl.cdiv(n, b_n)
    n_out = num_i * b_n           # output batch padded up to whole b_n blocks

    # Row-major reshape: free (no HBM copy), keeps native dtype.
    x3 = x2d.reshape(n, rows, _LANE)
    y3 = y2d.reshape(n, rows, _LANE)

    kernel = functools.partial(
        _dice_sums_kernel, b_n=b_n, r_block=r_block, sub_r=sub_r,
        rows_total=rows, num_k=num_k)

    bytes_in = int(x3.size) * x3.dtype.itemsize + int(y3.size) * y3.dtype.itemsize
    cost = pl.CostEstimate(
        flops=int(8 * n * d_pad),
        transcendentals=int(n * d_pad),
        bytes_accessed=int(bytes_in + 2 * n_out * _SUBLANE * _LANE * 4),
    )

    i_out, u_out = pl.pallas_call(
        kernel,
        out_shape=(
            jax.ShapeDtypeStruct((n_out, _SUBLANE, _LANE), jnp.float32),
            jax.ShapeDtypeStruct((n_out, _SUBLANE, _LANE), jnp.float32),
        ),
        grid_spec=pltpu.PrefetchScalarGridSpec(
            num_scalar_prefetch=0,
            grid=(num_i, num_k),
            in_specs=[
                pl.BlockSpec((b_n, r_block, _LANE), lambda i, k: (i, k, 0)),
                pl.BlockSpec((b_n, r_block, _LANE), lambda i, k: (i, k, 0)),
            ],
            out_specs=[
                pl.BlockSpec((b_n, _SUBLANE, _LANE), lambda i, k: (i, 0, 0)),
                pl.BlockSpec((b_n, _SUBLANE, _LANE), lambda i, k: (i, 0, 0)),
            ],
        ),
        compiler_params=pltpu.CompilerParams(
            # batch axis parallel (megacore on v7x); D axis is the reduction.
            dimension_semantics=("parallel", "arbitrary"),
            vmem_limit_bytes=_VMEM_LIMIT,
        ),
        cost_estimate=cost,
    )(x3, y3)

    # Tiny epilogue: reduce the (N, 8, 128) lane-wise partials per sample.
    i_per = jnp.sum(i_out[:n].reshape(n, -1), axis=1)
    u_per = jnp.sum(u_out[:n].reshape(n, -1), axis=1)
    return i_per, u_per


@functools.partial(jax.jit, static_argnames=("image",))
def dice_loss(x, y, *, image=False):
    """JAX/Pallas equivalent of DiceLoss(image=image)(x, y). x, y: NCHW."""
    n = x.shape[0]
    x2d = x.reshape(n, -1)       # native dtype; cast happens inside the kernel
    y2d = y.reshape(n, -1)

    i_per, u_per = _per_sample_sums(x2d, y2d)

    if image:
        dc = (2.0 * i_per + 1.0) / (u_per + 1.0)
        return 1.0 - jnp.mean(dc)
    else:
        i = jnp.sum(i_per)
        u = jnp.sum(u_per)
        return 1.0 - (2.0 * i + 1.0) / (u + 1.0)


def _reference(x, y, *, image=False):
    """Pure-JAX reference mirroring the PyTorch forward exactly."""
    s = jax.nn.sigmoid(x.astype(jnp.float32))
    yf = y.astype(jnp.float32)
    prod = s * yf
    add = s + yf
    if image:
        i = prod.reshape(prod.shape[0], -1).sum(axis=1)
        u = add.reshape(add.shape[0], -1).sum(axis=1)
    else:
        i = prod.sum()
        u = add.sum()
    dc = (2.0 * i + 1.0) / (u + 1.0)
    return 1.0 - jnp.mean(dc)


if __name__ == "__main__":
    key = jax.random.PRNGKey(0)
    kx, ky = jax.random.split(key)

    # NCHW, small shapes: batch=2, channels=4, spatial=16x16 -> D = 1024
    x = jax.random.normal(kx, (2, 4, 16, 16), dtype=jnp.float32)
    y = (jax.random.uniform(ky, (2, 4, 16, 16)) > 0.5).astype(jnp.float32)

    ok = True
    for image in (False, True):
        out = jax.block_until_ready(dice_loss(x, y, image=image))
        ref = jax.block_until_ready(_reference(x, y, image=image))
        if not jnp.allclose(out, ref, rtol=1e-5, atol=1e-5):
            ok = False
            print(f"MISMATCH image={image}: kernel={out} ref={ref}")

    if ok:
        print("KERNEL_OK")
</pallas_src>

<mosaic_0001>
module attributes {stable_mosaic.version = 11 : i64} {
  func.func @_dice_sums_kernel(%arg0: i32, %arg1: i32, %arg2: memref<2x8x128xf32, #tpu.memory_space<vmem>>, %arg3: memref<2x8x128xf32, #tpu.memory_space<vmem>>, %arg4: memref<2x8x128xf32, #tpu.memory_space<vmem>>, %arg5: memref<2x8x128xf32, #tpu.memory_space<vmem>>) attributes {dimension_semantics = [#tpu.dimension_semantics<parallel>, #tpu.dimension_semantics<arbitrary>], iteration_bounds = array<i64: 1, 1>, scalar_prefetch = 0 : i64, scratch_operands = 0 : i64, tpu.core_type = #tpu.core_type<tc>, window_params = [{transform_indices = @transform_0, window_bounds = array<i64: 2, 8, 128>}, {transform_indices = @transform_1, window_bounds = array<i64: 2, 8, 128>}, {transform_indices = @transform_2, window_bounds = array<i64: 2, 8, 128>}, {transform_indices = @transform_3, window_bounds = array<i64: 2, 8, 128>}]} {
    %c0_i32 = arith.constant 0 : i32
    %0 = arith.cmpi eq, %arg1, %c0_i32 : i32
    %1 = arith.extui %0 : i1 to i32
    %c0_i32_0 = arith.constant 0 : i32
    %2 = arith.cmpi ne, %1, %c0_i32_0 : i32
    scf.if %2 {
      %cst_22 = arith.constant 0.000000e+00 : f32
      %24 = vector.broadcast %cst_22 : f32 to vector<2x8x128xf32>
      %c0_23 = arith.constant 0 : index
      %c0_24 = arith.constant 0 : index
      %c0_25 = arith.constant 0 : index
      %25 = vector.load %arg4[%c0_23, %c0_24, %c0_25] : memref<2x8x128xf32, #tpu.memory_space<vmem>>, vector<2x8x128xf32>
      tpu.vector_store %arg4[%c0_23, %c0_24, %c0_25], %24 {strides = array<i32>} : memref<2x8x128xf32, #tpu.memory_space<vmem>>, vector<2x8x128xf32>,
      %cst_26 = arith.constant 0.000000e+00 : f32
      %26 = vector.broadcast %cst_26 : f32 to vector<2x8x128xf32>
      %c0_27 = arith.constant 0 : index
      %c0_28 = arith.constant 0 : index
      %c0_29 = arith.constant 0 : index
      %27 = vector.load %arg5[%c0_27, %c0_28, %c0_29] : memref<2x8x128xf32, #tpu.memory_space<vmem>>, vector<2x8x128xf32>
      tpu.vector_store %arg5[%c0_27, %c0_28, %c0_29], %26 {strides = array<i32>} : memref<2x8x128xf32, #tpu.memory_space<vmem>>, vector<2x8x128xf32>,
    } else {
    }
    %cst = arith.constant 0.000000e+00 : f32
    %3 = vector.broadcast %cst : f32 to vector<2x8x128xf32>
    %cst_1 = arith.constant 0.000000e+00 : f32
    %4 = vector.broadcast %cst_1 : f32 to vector<2x8x128xf32>
    %c0 = arith.constant 0 : index
    %c0_2 = arith.constant 0 : index
    %c0_3 = arith.constant 0 : index
    %5 = vector.load %arg2[%c0, %c0_2, %c0_3] : memref<2x8x128xf32, #tpu.memory_space<vmem>>, vector<2x8x128xf32>
    %c0_4 = arith.constant 0 : index
    %c0_5 = arith.constant 0 : index
    %c0_6 = arith.constant 0 : index
    %6 = vector.load %arg3[%c0_4, %c0_5, %c0_6] : memref<2x8x128xf32, #tpu.memory_space<vmem>>, vector<2x8x128xf32>
    %cst_7 = arith.constant 5.000000e-01 : f32
    %7 = vector.broadcast %cst_7 : f32 to vector<2x8x128xf32>
    %8 = arith.mulf %7, %5 : vector<2x8x128xf32>
    %9 = math.tanh %8 : vector<2x8x128xf32>
    %cst_8 = arith.constant 1.000000e+00 : f32
    %10 = vector.broadcast %cst_8 : f32 to vector<2x8x128xf32>
    %11 = arith.addf %9, %10 : vector<2x8x128xf32>
    %cst_9 = arith.constant 5.000000e-01 : f32
    %12 = vector.broadcast %cst_9 : f32 to vector<2x8x128xf32>
    %13 = arith.mulf %12, %11 : vector<2x8x128xf32>
    %14 = arith.mulf %13, %6 : vector<2x8x128xf32>
    %15 = arith.addf %3, %14 : vector<2x8x128xf32>
    %16 = arith.addf %13, %6 : vector<2x8x128xf32>
    %17 = arith.addf %4, %16 : vector<2x8x128xf32>
    %c0_10 = arith.constant 0 : index
    %c0_11 = arith.constant 0 : index
    %c0_12 = arith.constant 0 : index
    %18 = vector.load %arg4[%c0_10, %c0_11, %c0_12] : memref<2x8x128xf32, #tpu.memory_space<vmem>>, vector<2x8x128xf32>
    %19 = arith.addf %18, %15 : vector<2x8x128xf32>
    %c0_13 = arith.constant 0 : index
    %c0_14 = arith.constant 0 : index
    %c0_15 = arith.constant 0 : index
    %20 = vector.load %arg4[%c0_13, %c0_14, %c0_15] : memref<2x8x128xf32, #tpu.memory_space<vmem>>, vector<2x8x128xf32>
    tpu.vector_store %arg4[%c0_13, %c0_14, %c0_15], %19 {strides = array<i32>} : memref<2x8x128xf32, #tpu.memory_space<vmem>>, vector<2x8x128xf32>,
    %c0_16 = arith.constant 0 : index
    %c0_17 = arith.constant 0 : index
    %c0_18 = arith.constant 0 : index
    %21 = vector.load %arg5[%c0_16, %c0_17, %c0_18] : memref<2x8x128xf32, #tpu.memory_space<vmem>>, vector<2x8x128xf32>
    %22 = arith.addf %21, %17 : vector<2x8x128xf32>
    %c0_19 = arith.constant 0 : index
    %c0_20 = arith.constant 0 : index
    %c0_21 = arith.constant 0 : index
    %23 = vector.load %arg5[%c0_19, %c0_20, %c0_21] : memref<2x8x128xf32, #tpu.memory_space<vmem>>, vector<2x8x128xf32>
    tpu.vector_store %arg5[%c0_19, %c0_20, %c0_21], %22 {strides = array<i32>} : memref<2x8x128xf32, #tpu.memory_space<vmem>>, vector<2x8x128xf32>,
    return
  }
  func.func @transform_0(%arg0: i32, %arg1: i32) -> (i32, i32, i32) {
    %c0_i32 = arith.constant 0 : i32
    %c0_i32_0 = arith.constant 0 : i32
    return %arg0, %arg1, %c0_i32 : i32, i32, i32
  }
  func.func @transform_1(%arg0: i32, %arg1: i32) -> (i32, i32, i32) {
    %c0_i32 = arith.constant 0 : i32
    %c0_i32_0 = arith.constant 0 : i32
    return %arg0, %arg1, %c0_i32 : i32, i32, i32
  }
  func.func @transform_2(%arg0: i32, %arg1: i32) -> (i32, i32, i32) {
    %c0_i32 = arith.constant 0 : i32
    %c0_i32_0 = arith.constant 0 : i32
    %c0_i32_1 = arith.constant 0 : i32
    return %arg0, %c0_i32, %c0_i32_0 : i32, i32, i32
  }
  func.func @transform_3(%arg0: i32, %arg1: i32) -> (i32, i32, i32) {
    %c0_i32 = arith.constant 0 : i32
    %c0_i32_0 = arith.constant 0 : i32
    %c0_i32_1 = arith.constant 0 : i32
    return %arg0, %c0_i32, %c0_i32_0 : i32, i32, i32
  }
}

</mosaic_0001>

<bundles_post_ra>
// kernel: dice_loss.1
= control target key start
LH: loop header
LB: loop body
LE: loop exit
PB: predicated region body
PF: predicated region fallthrough
CT: control target
= control target key end

     0   :  { %s110_s0 = inlined_call_operand.vmem [shape: f32[2,8,128], index: 0, kind: input, shape index: {}]   ;;  %s111_s1 = inlined_call_operand.vmem [shape: f32[2,8,128], index: 1, kind: input, shape index: {}]   ;;  %s112_s2 = inlined_call_operand.vmem [shape: f32[2,8,128], index: 2, kind: output, shape index: {0}]   ;;  %s113_s3 = inlined_call_operand.vmem [shape: f32[2,8,128], index: 3, kind: output, shape index: {1}]  }
   0x1   :  { %v21_v0 = vld [vmem:[%s110_s0] sm:$0xff]  ;;  %v22_v1 = vld [vmem:[%s110_s0 + $0x8] sm:$0xff] }
   0x2   :  { %v25_v2 = vmul.f32 0.5, %v21_v0  ;;  %v26_v3 = vmul.f32 0.5, %v22_v1  ;;  %v23_v7 = vld [vmem:[%s111_s1] sm:$0xff]  ;;  %v24_v10 = vld [vmem:[%s111_s1 + $0x8] sm:$0xff] }
   0x4   :  { %62 = vtanh.f32 %v25_v2 }
   0x5   :  { %64 = vtanh.f32 %v26_v3 }
   0xa   :  { %v63_v4 = vpop.eup %62 }
   0xb   :  { %v65_v5 = vpop.eup %64  ;;  %v29_v6 = vadd.f32 1.0, %v63_v4 }
   0xc   :  { %v30_v8 = vadd.f32 1.0, %v65_v5 }
   0xd   :  { %v31_v9 = vmul.f32 0.5, %v29_v6 }
   0xe   :  { %v32_v11 = vmul.f32 0.5, %v30_v8 }
   0xf   :  { %v33_v12 = vmul.f32 %v31_v9, %v23_v7  ;;  %v37_v13 = vadd.f32 %v31_v9, %v23_v7 }
  0x10   :  { %v34_v14 = vmul.f32 %v32_v11, %v24_v10  ;;  %v38_v15 = vadd.f32 %v32_v11, %v24_v10 }
  0x11   :  { %45 = vst [vmem:[%s112_s2] sm:$0xff] %v33_v12 }
  0x12   :  { %46 = vst [vmem:[%s112_s2 + $0x8] sm:$0xff] %v34_v14 }
  0x13   :  { %51 = vst [vmem:[%s113_s3] sm:$0xff] %v37_v13 }
  0x14   :  { %52 = vst [vmem:[%s113_s3 + $0x8] sm:$0xff] %v38_v15 }

</bundles_post_ra>
